<compile_context>
chip_gen: v7x
topology: tpu7x:2x2x1
jax: 0.10.0
libtpu: 0.0.40
codegen_flags: <defaults>
</compile_context>

<pallas_src>
import functools

import jax
import jax.numpy as jnp
from jax.experimental import pallas as pl
from jax.experimental.pallas import tpu as pltpu

NEG_SLOPE = 0.2
EPS = 1e-5
KW = 4        # kernel size
PADW = 1      # padding

TILE_P_MAX = 512      # spatial rows per block (multiple of 16)
TILE_K_MAX = 2048     # reduction chunk (multiple of 128)
LANE = 128
VMEM_LIMIT = 32 * 1024 * 1024


def _round_up(x, m):
    return (x + m - 1) // m * m


def _leaky(y):
    return jnp.where(y > 0, y, NEG_SLOPE * y)


# ---------------------------------------------------------------------------
# Pass 1: tiled matmul (+bias, +act or partial-stats emission)
# ---------------------------------------------------------------------------
def _conv_mm_kernel(p_ref, w_ref, b_ref, y_ref, *rest, use_norm, use_act,
                    single_k, tile_p, p_actual):
    # p_ref : (1, tile_p, tile_k)  bf16 im2col patches tile
    # w_ref : (tile_k, c_pad)      bf16 weight tile (VMEM-resident across n, p)
    # b_ref : (1, c_pad)           f32 bias (zeros when the conv has no bias)
    # y_ref : (1, tile_p, c_pad)   pre-norm (f32) or final activation (bf16/f32)
    # stats : (1, 8, c_pad)        row0 = partial sum, row1 = partial sum-of-sq
    rest = list(rest)
    stats_ref = rest.pop(0) if use_norm else None
    acc_ref = rest.pop(0) if not single_k else None

    p_idx = pl.program_id(1)

    def _finish(y):                                  # y: (tile_p, c_pad) f32
        if use_norm:
            # Mask padded spatial rows out of the statistics.
            row = (jax.lax.broadcasted_iota(jnp.int32, (tile_p, 1), 0)
                   + p_idx * tile_p)
            ym = jnp.where(row < p_actual, y, 0.0)
            s1 = jnp.sum(ym, axis=0, keepdims=True)          # (1, c_pad)
            s2 = jnp.sum(ym * ym, axis=0, keepdims=True)     # (1, c_pad)
            row8 = jax.lax.broadcasted_iota(jnp.int32, (8, 1), 0)
            stats_ref[0] = (jnp.where(row8 == 0, s1, 0.0)
                            + jnp.where(row8 == 1, s2, 0.0))  # (8, c_pad)
            y_ref[0] = y.astype(y_ref.dtype)
        else:
            if use_act:
                y = _leaky(y)
            y_ref[0] = y.astype(y_ref.dtype)

    if single_k:
        # Whole reduction fits one K tile: no accumulator scratch round trip.
        y = (jnp.dot(p_ref[0], w_ref[...], preferred_element_type=jnp.float32)
             + b_ref[...])
        _finish(y)
    else:
        k_idx = pl.program_id(2)
        n_k = pl.num_programs(2)

        @pl.when(k_idx == 0)
        def _():
            acc_ref[...] = jnp.zeros_like(acc_ref)

        acc_ref[...] += jnp.dot(p_ref[0], w_ref[...],
                                preferred_element_type=jnp.float32)

        @pl.when(k_idx == n_k - 1)
        def _():
            _finish(acc_ref[...] + b_ref[...])


# ---------------------------------------------------------------------------
# Pass 2: instance-norm (affine=False) + LeakyReLU, fully tiled elementwise
# ---------------------------------------------------------------------------
def _norm_act_kernel(y_ref, s_ref, o_ref, *, inv_p, use_act):
    y = y_ref[0]                                # (tile_p, c_pad) f32
    s = s_ref[0]                                # (8, c_pad): row0=sum, row1=sumsq
    mean = s[0:1, :] * inv_p
    var = jnp.maximum(s[1:2, :] * inv_p - mean * mean, 0.0)
    rstd = jax.lax.rsqrt(var + EPS)             # f32 rsqrt (EUP)
    yn = (y - mean) * rstd
    if use_act:
        yn = _leaky(yn)
    o_ref[0] = yn.astype(o_ref.dtype)


# ---------------------------------------------------------------------------
# One discriminator layer
# ---------------------------------------------------------------------------
def conv_block(x, w, b, stride, use_norm, use_act, out_dtype):
    """x: (N, H, W, Cin) NHWC; w: (KW, KW, Cin, Cout)."""
    N, H, W, Cin = x.shape
    Cout = w.shape[-1]
    Hout = (H + 2 * PADW - KW) // stride + 1
    Wout = (W + 2 * PADW - KW) // stride + 1
    P = Hout * Wout
    KKC = KW * KW * Cin

    # ---- glue: im2col (data movement only), bf16 operands for the MXU ----
    # TODO(synk): replace the materialized im2col with in-kernel tap
    # accumulation over the padded input (manual DMA / halo blocks) to cut the
    # HBM read traffic of stride-1 layers by up to ~16x.
    x_pad = jnp.pad(x.astype(jnp.bfloat16),
                    ((0, 0), (PADW, PADW), (PADW, PADW), (0, 0)))
    cols = []
    for kh in range(KW):
        for kw_ in range(KW):
            cols.append(x_pad[:, kh: kh + stride * (Hout - 1) + 1: stride,
                                 kw_: kw_ + stride * (Wout - 1) + 1: stride, :])
    patches = jnp.stack(cols, axis=3).reshape(N, P, KKC)

    # ---- pad to TPU-friendly tiles (sublane mult of 16, lane mult of 128) ----
    tile_p = min(TILE_P_MAX, _round_up(P, 16))
    tile_k = min(TILE_K_MAX, _round_up(KKC, LANE))
    p_pad = _round_up(P, tile_p)
    k_pad = _round_up(KKC, tile_k)
    c_pad = _round_up(Cout, LANE)

    patches = jnp.pad(patches, ((0, 0), (0, p_pad - P), (0, k_pad - KKC)))
    w2 = jnp.pad(w.reshape(KKC, Cout).astype(jnp.bfloat16),
                 ((0, k_pad - KKC), (0, c_pad - Cout)))
    bias = jnp.zeros((Cout,), jnp.float32) if b is None else b.astype(jnp.float32)
    bias = jnp.pad(bias, (0, c_pad - Cout)).reshape(1, c_pad)

    num_p = p_pad // tile_p
    num_k = k_pad // tile_k
    grid = (N, num_p, num_k)
    single_k = num_k == 1

    def cparams(dims):
        return pltpu.CompilerParams(dimension_semantics=dims,
                                    vmem_limit_bytes=VMEM_LIMIT)

    in_specs = [
        pl.BlockSpec((1, tile_p, tile_k), lambda n, p, k: (n, p, k)),
        pl.BlockSpec((tile_k, c_pad), lambda n, p, k: (k, 0)),   # resident over n,p
        pl.BlockSpec((1, c_pad), lambda n, p, k: (0, 0)),        # resident
    ]
    y_spec = pl.BlockSpec((1, tile_p, c_pad), lambda n, p, k: (n, p, 0))

    kernel = functools.partial(_conv_mm_kernel, use_norm=use_norm,
                               use_act=use_act, single_k=single_k,
                               tile_p=tile_p, p_actual=P)
    mm_dtype = jnp.float32 if use_norm else out_dtype

    if use_norm:
        # Per-(n, p-tile) partial statistics: every block is fully written once,
        # so no output revisiting and both n and p stay "parallel".
        out_shape = (jax.ShapeDtypeStruct((N, p_pad, c_pad), mm_dtype),
                     jax.ShapeDtypeStruct((N * num_p, 8, c_pad), jnp.float32))
        out_specs = (y_spec,
                     pl.BlockSpec((1, 8, c_pad),
                                  lambda n, p, k: (n * num_p + p, 0, 0)))
    else:
        out_shape = jax.ShapeDtypeStruct((N, p_pad, c_pad), mm_dtype)
        out_specs = y_spec

    scratch = () if single_k else (pltpu.VMEM((tile_p, c_pad), jnp.float32),)

    res = pl.pallas_call(
        kernel,
        out_shape=out_shape,
        grid=grid,
        in_specs=in_specs,
        out_specs=out_specs,
        scratch_shapes=scratch,
        compiler_params=cparams(("parallel", "parallel", "arbitrary")),
    )(patches, w2, bias)

    if use_norm:
        y, part = res
        # Tiny cross-tile reduction of the partial statistics (XLA glue).
        stats = part.reshape(N, num_p, 8, c_pad).sum(axis=1)
        norm_kernel = functools.partial(_norm_act_kernel, inv_p=1.0 / P,
                                        use_act=use_act)
        res = pl.pallas_call(
            norm_kernel,
            out_shape=jax.ShapeDtypeStruct((N, p_pad, c_pad), out_dtype),
            grid=(N, num_p),
            in_specs=[pl.BlockSpec((1, tile_p, c_pad), lambda n, p: (n, p, 0)),
                      pl.BlockSpec((1, 8, c_pad), lambda n, p: (n, 0, 0))],
            out_specs=pl.BlockSpec((1, tile_p, c_pad), lambda n, p: (n, p, 0)),
            compiler_params=cparams(("parallel", "parallel")),
        )(y, stats)

    return res[:, :P, :Cout].reshape(N, Hout, Wout, Cout)


# ---------------------------------------------------------------------------
# Module definition (mirrors NLayerDiscriminator.__init__)
# ---------------------------------------------------------------------------
def build_layer_specs(input_nc, ndf=64, n_layers=3):
    # (cin, cout, stride, use_bias, use_norm, use_act)
    specs = [(input_nc, ndf, 2, True, False, True)]
    nf_mult = 1
    for n in range(1, n_layers):
        prev, nf_mult = nf_mult, min(2 ** n, 8)
        specs.append((ndf * prev, ndf * nf_mult, 2, False, True, True))
    prev, nf_mult = nf_mult, min(2 ** n_layers, 8)
    specs.append((ndf * prev, ndf * nf_mult, 1, False, True, True))
    specs.append((ndf * nf_mult, 1, 1, True, False, False))
    return specs


def init_params(key, specs):
    params = []
    keys = jax.random.split(key, 2 * len(specs))
    for i, (cin, cout, stride, use_bias, use_norm, use_act) in enumerate(specs):
        w = jax.random.normal(keys[2 * i], (KW, KW, cin, cout), jnp.float32) * 0.05
        b = (jax.random.normal(keys[2 * i + 1], (cout,), jnp.float32) * 0.05
             if use_bias else None)
        params.append((w, b, stride, use_norm, use_act))
    return params


def discriminator_forward(x_nchw, params):
    x = jnp.transpose(x_nchw, (0, 2, 3, 1)).astype(jnp.float32)   # NCHW -> NHWC
    last = len(params) - 1
    for i, (w, b, stride, use_norm, use_act) in enumerate(params):
        out_dtype = jnp.float32 if i == last else jnp.bfloat16
        x = conv_block(x, w, b, stride, use_norm, use_act, out_dtype)
    return jnp.transpose(x, (0, 3, 1, 2))                         # back to NCHW


# ---------------------------------------------------------------------------
# Pure-JAX references
#   emulate_bf16=True mirrors the kernel's bf16 operand / activation casts
#   (f32 accumulation everywhere) -> tight correctness check.
#   emulate_bf16=False is the exact f32 module -> loose sanity bound.
# ---------------------------------------------------------------------------
def reference_forward(x_nchw, params, emulate_bf16=False):
    def q(a):
        return a.astype(jnp.bfloat16).astype(jnp.float32) if emulate_bf16 else a

    y = x_nchw.astype(jnp.float32)
    last = len(params) - 1
    for i, (w, b, stride, use_norm, use_act) in enumerate(params):
        w_oihw = jnp.transpose(q(w.astype(jnp.float32)), (3, 2, 0, 1))
        y = jax.lax.conv_general_dilated(
            q(y), w_oihw, (stride, stride), ((PADW, PADW), (PADW, PADW)),
            dimension_numbers=("NCHW", "OIHW", "NCHW"),
            precision=jax.lax.Precision.HIGHEST)
        if b is not None:
            y = y + b.reshape(1, -1, 1, 1)
        if use_norm:
            mean = y.mean(axis=(2, 3), keepdims=True)
            var = ((y - mean) ** 2).mean(axis=(2, 3), keepdims=True)
            y = (y - mean) * jax.lax.rsqrt(var + EPS)
        if use_act:
            y = jnp.where(y > 0, y, NEG_SLOPE * y)
        if i != last:
            y = q(y)
    return y


if __name__ == "__main__":
    key = jax.random.PRNGKey(0)
    k_x, k_p = jax.random.split(key)

    # Small but consistent shapes: batch=2, input_nc=3, 32x32 spatial, ndf=8.
    N, input_nc, H, W = 2, 3, 32, 32
    ndf, n_layers = 8, 3
    x = jax.random.normal(k_x, (N, input_nc, H, W), jnp.float32)

    specs = build_layer_specs(input_nc, ndf=ndf, n_layers=n_layers)
    params = init_params(k_p, specs)

    out = jax.block_until_ready(discriminator_forward(x, params))

    # Tight check vs. a reference using the same bf16 operand quantization.
    ref_bf16 = jax.block_until_ready(reference_forward(x, params, emulate_bf16=True))
    assert out.shape == ref_bf16.shape, (out.shape, ref_bf16.shape)
    max_err = float(jnp.max(jnp.abs(out - ref_bf16)))
    assert jnp.allclose(out, ref_bf16, atol=5e-3, rtol=5e-3), max_err

    # Loose sanity bound vs. the exact f32 module (bf16 drift only).
    ref_f32 = jax.block_until_ready(reference_forward(x, params, emulate_bf16=False))
    assert float(jnp.max(jnp.abs(out - ref_f32))) < 0.5

    print("KERNEL_OK")
</pallas_src>

<mosaic_0001>
module attributes {stable_mosaic.version = 11 : i64} {
  func.func @_conv_mm_kernel(%arg0: i32, %arg1: i32, %arg2: i32, %arg3: memref<1x256x128xbf16, #tpu.memory_space<vmem>>, %arg4: memref<128x128xbf16, #tpu.memory_space<vmem>>, %arg5: memref<1x128xf32, #tpu.memory_space<vmem>>, %arg6: memref<1x256x128xbf16, #tpu.memory_space<vmem>>) attributes {dimension_semantics = [#tpu.dimension_semantics<parallel>, #tpu.dimension_semantics<parallel>, #tpu.dimension_semantics<arbitrary>], iteration_bounds = array<i64: 2, 1, 1>, scalar_prefetch = 0 : i64, scratch_operands = 0 : i64, tpu.core_type = #tpu.core_type<tc>, window_params = [{transform_indices = @transform_0, window_bounds = array<i64: 1, 256, 128>}, {transform_indices = @transform_1, window_bounds = array<i64: 128, 128>}, {pipeline_mode = #tpu.pipeline_mode<synchronous>, transform_indices = @transform_2, window_bounds = array<i64: 1, 128>}, {transform_indices = @transform_3, window_bounds = array<i64: 1, 256, 128>}]} {
    %c0 = arith.constant 0 : index
    %c0_0 = arith.constant 0 : index
    %c0_1 = arith.constant 0 : index
    %0 = vector.load %arg3[%c0, %c0_0, %c0_1] : memref<1x256x128xbf16, #tpu.memory_space<vmem>>, vector<1x256x128xbf16>
    %1 = vector.shape_cast %0 : vector<1x256x128xbf16> to vector<256x128xbf16>
    %c0_2 = arith.constant 0 : index
    %c0_3 = arith.constant 0 : index
    %2 = vector.load %arg4[%c0_2, %c0_3] : memref<128x128xbf16, #tpu.memory_space<vmem>>, vector<128x128xbf16>
    %cst = arith.constant dense<0.000000e+00> : vector<256x128xf32>
    %3 = tpu.matmul %1, %2, %cst {dimension_numbers = #tpu.dot_dimension_numbers<[1], [0], [0], [1], [0, 0, 1, 1], [], []>} : vector<256x128xbf16>, vector<128x128xbf16>, vector<256x128xf32> -> vector<256x128xf32>
    %c0_4 = arith.constant 0 : index
    %c0_5 = arith.constant 0 : index
    %4 = vector.load %arg5[%c0_4, %c0_5] : memref<1x128xf32, #tpu.memory_space<vmem>>, vector<1x128xf32>
    %5 = vector.broadcast %4 : vector<1x128xf32> to vector<256x128xf32>
    %6 = arith.addf %3, %5 : vector<256x128xf32>
    %cst_6 = arith.constant 0.000000e+00 : f32
    %7 = vector.broadcast %cst_6 : f32 to vector<256x128xf32>
    %8 = arith.cmpf ogt, %6, %7 : vector<256x128xf32>
    %cst_7 = arith.constant 2.000000e-01 : f32
    %9 = vector.broadcast %cst_7 : f32 to vector<256x128xf32>
    %10 = arith.mulf %9, %6 : vector<256x128xf32>
    %11 = arith.select %8, %6, %10 : vector<256x128xi1>, vector<256x128xf32>
    %12 = arith.truncf %11 : vector<256x128xf32> to vector<256x128xbf16>
    %c0_8 = arith.constant 0 : index
    %c0_9 = arith.constant 0 : index
    %c0_10 = arith.constant 0 : index
    %13 = vector.load %arg6[%c0_8, %c0_9, %c0_10] : memref<1x256x128xbf16, #tpu.memory_space<vmem>>, vector<1x256x128xbf16>
    %14 = vector.shape_cast %13 : vector<1x256x128xbf16> to vector<256x128xbf16>
    %15 = vector.shape_cast %12 : vector<256x128xbf16> to vector<1x256x128xbf16>
    tpu.vector_store %arg6[%c0_8, %c0_9, %c0_10], %15 {strides = array<i32>} : memref<1x256x128xbf16, #tpu.memory_space<vmem>>, vector<1x256x128xbf16>,
    return
  }
  func.func @transform_0(%arg0: i32, %arg1: i32, %arg2: i32) -> (i32, i32, i32) {
    %c0_i32 = arith.constant 0 : i32
    return %arg0, %arg1, %arg2 : i32, i32, i32
  }
  func.func @transform_1(%arg0: i32, %arg1: i32, %arg2: i32) -> (i32, i32) {
    %c0_i32 = arith.constant 0 : i32
    %c0_i32_0 = arith.constant 0 : i32
    return %arg2, %c0_i32 : i32, i32
  }
  func.func @transform_2(%arg0: i32, %arg1: i32, %arg2: i32) -> (i32, i32) {
    %c0_i32 = arith.constant 0 : i32
    %c0_i32_0 = arith.constant 0 : i32
    %c0_i32_1 = arith.constant 0 : i32
    return %c0_i32, %c0_i32_0 : i32, i32
  }
  func.func @transform_3(%arg0: i32, %arg1: i32, %arg2: i32) -> (i32, i32, i32) {
    %c0_i32 = arith.constant 0 : i32
    %c0_i32_0 = arith.constant 0 : i32
    return %arg0, %arg1, %c0_i32 : i32, i32, i32
  }
}

</mosaic_0001>

<bundles_post_ra>
// kernel: tpu_custom_call.1
= control target key start
LH: loop header
LB: loop body
LE: loop exit
PB: predicated region body
PF: predicated region fallthrough
CT: control target
= control target key end

     0   :  { %8 = vsyncpa [#allocation3], 0  ;;  %s1853_s0 = inlined_call_operand.hbm [shape: bf16[2,256,128], index: 0, kind: input, shape index: {}]   ;;  %s1854_s1 = inlined_call_operand.hbm [shape: bf16[128,128], index: 1, kind: input, shape index: {}]   ;;  %s1855_s2 = inlined_call_operand.vmem [shape: f32[1,128], index: 2, kind: input, shape index: {}]   ;;  %s1856_s3 = inlined_call_operand.hbm [shape: bf16[2,256,128], index: 3, kind: output, shape index: {}]  }
   0x1   :  { %10 = vsyncpa [#allocation3 + $0x1], 0 }
   0x2   :  { %11 = vsyncpa [#allocation6], 0 }
   0x3   :  { %12 = vsyncpa [#allocation4], 0 }
   0x4   :  { %14 = vsyncpa [#allocation4 + $0x1], 0  ;;  %s1544_s12 = smov 0   ;;  %s1546_s13 = smov 0  }
   0x5   :  { %s1548_s14 = smov 0   ;;  %s1550_s15 = smov 0  }
   0x6   :  { %s1552_s16 = smov 0   ;;  %s1554_s17 = smov 0  }
   0x7 LB: > { %s979_s18 = sadd.s32 4294967295, %s1515_s17   ;;  %s980_s19 = sadd.s32 4294967294, %s1515_s17   ;;  %s1515_s17 = sphi %s1554_s17, %s20_s17   ;;  %s1511_s16 = sphi %s1552_s16, %s1880_s16   ;;  %s1507_s15 = sphi %s1550_s15, %s1879_s15   ;;  %s1503_s14 = sphi %s1548_s14, %s1878_s14   ;;  %s1499_s13 = sphi %s1546_s13, %s1877_s13   ;;  %s1495_s12 = sphi %s1544_s12, %s1876_s12  }
   0x8   : > { %p63_p0 = scmp.ne.s32.totalorder %s1499_s13, %s1495_s12  ;;  %p1578_p1 = scmp.eq.s32.totalorder %s979_s18, 0 }
   0x9   : > { %p1582_p2 = scmp.eq.s32.totalorder %s979_s18, 1  ;;  %p142_p3 = scmp.eq.s32.totalorder %s980_s19, 1 }
   0xa   : > { %s1861_s20 = scalar_select %p1578_p1, 1, 0 }
   0xb   : > { %s1862_s21 = scalar_select %p1582_p2, 1, 0 }
   0xc   : > { %p1588_p4 = por %p1578_p1, %p63_p0  ;;  %p981_p5 = scmp.ge.s32.totalorder %s1515_s17, 1 }
   0xd   : > { %p1593_p6 = por %p142_p3, %p63_p0  ;;  %p149_p7 = scmp.lt.s32.totalorder %s1515_s17, 3 }
   0xe   : > { %s1863_s22 = scalar_select %p1588_p4, 1, 0 }
   0xf   : > { %s1864_s23 = scalar_select %p1593_p6, 1, 0 }
  0x10   : > { %p1598_p8 = pnand %p981_p5, %p149_p7  ;;  %s1517_s25 = smov [#allocation5]  }
  0x11   : > { %s164_s26 = sshll.u32 %s1517_s25, 4  ;;  %s39_s28 = sadd.s32 1, %s1511_s16  ;;  %s165_s26 = int_to_ptr.vmem [resolvable:$true] %s164_s26 }
  0x12   : > { %s1865_s24 = scalar_select %p1598_p8, 1, 0 }
  0x13   : > { %p1278_p9 = pneg %p1598_p8  ;;  %s1371_s4 = scalar_lea.hbm %s1854_s1, 1024 }
  0x14   : > { %p1372_p12 = scmp.ne.s32.totalorder %s1854_s1, %s1371_s4  ;;  %p1378_p5 = scmp.lt.u32.totalorder %s1371_s4, %s1854_s1 }
  0x15   : > { %p1607_p11 = pnand %p1278_p9, %p1578_p1 }
  0x17   : > { %p1373_p13 = pneg %p1607_p11 }
  0x19   : > { %p1374_p0 = pnand %p1373_p13, %p1372_p12 }
  0x1b   : > { %p1375_p3 = pneg %p1374_p0 }
  0x1d   : > { %p1380_p7 = pnand %p1378_p5, %p1375_p3 }
  0x1f   : > { %1383 = shalt.err (!%p1380_p7)
}
  0x20   : > { %s1384_s9 = scalar_lea.vmem %s165_s26, 1024  ;;  %p1392_p1 = scmp.lt.s32.totalorder %s165_s26, %s165_s26 }
  0x21   : > { %p1385_p9 = scmp.ne.s32.totalorder %s165_s26, %s1384_s9  ;;  %p1393_p4 = scmp.lt.s32.totalorder %s1384_s9, %s1384_s9 }
  0x23   : > { %p1387_p10 = pnand %p1385_p9, %p1373_p13  ;;  %p1394_p8 = por %p1393_p4, %p1392_p1 }
  0x25   : > { %p1388_p6 = pneg %p1387_p10 }
  0x27   : > { %p1395_p2 = pnand %p1394_p8, %p1388_p6 }
  0x29   : > { %1398 = shalt.err (!%p1395_p2)
}
  0x2a   : > { %s1518_s10 = smov 64   ;;  %s1519_s11 = smov 4  }
  0x2b   : > { %1281 = dma.hbm_to_vmem [thread:$0]  (!%p1607_p11), %s1854_s1, 1024, %s165_s26, [#allocation6], %s1518_s10, %s1518_s10, %s1519_s11  }
  0x2c   : > { %p41_p1 = scmp.ge.s32.totalorder %s39_s28, 2  ;;  %s50_s25 = sadd.s32 1, %s1503_s14 }
  0x2d   : > { %p57_p2 = scmp.ne.s32.totalorder %s1503_s14, %s1499_s13  ;;  %p58_p4 = scmp.eq.s32.totalorder %s1515_s17, 0 }
  0x2e   : > { %s1882_s28 = smov (%p41_p1, %s39_s28), 0  ;;  %p1868_p8 = scmp.ne.s32.totalorder %s1862_s21, 0 }
  0x2f   : > { %p1637_p6 = por %p58_p4, %p57_p2  ;;  %s43_s30 = ssub.s32 %s1511_s16, %s1882_s28 }
  0x30   : > { %p1643_p10 = por %p1868_p8, %p57_p2  ;;  %p1291_p12 = scmp.lt.s32.totalorder %s1515_s17, 2 }
  0x31   : > { %p48_p11 = scmp.eq.s32.totalorder %s43_s30, 0  ;;  %s181_s26 = sand.u32 1, %s1503_s14  }
  0x32   : > { %s984_s4 = sshll.u32 %s181_s26, 7  ;;  %s1053_s6 = sshll.u32 %s1511_s16, 11 }
  0x33   : > { %s1652_s5 = scalar_select %p48_p11, %s1503_s14, %s50_s25  }
  0x34   : > { %s1658_s9 = scalar_lea.hbm %s1853_s0, %s1053_s6  ;;  %s185_s21 = scalar_lea.vmem [#allocation2], %s984_s4 }
  0x35   : > { %s195_s18 = sshll.u32 %s185_s21, 4  ;;  %p1664_p13 = pnand %p1291_p12, %p1637_p6  ;;  %s1660_s18 = int_to_ptr.vmem [resolvable:$true] %s195_s18 }
  0x36   : > { %s1668_s25 = scalar_lea.sflag [#allocation3], %s181_s26  ;;  %s1399_s30 = scalar_lea.hbm %s1658_s9, 2048 }
  0x37   : > { %p1400_p0 = scmp.ne.s32.totalorder %s1658_s9, %s1399_s30  ;;  %p1401_p3 = pneg %p1664_p13 }
  0x38   : > { %s1404_s29 = scalar_lea.hbm %s1853_s0, 4096  ;;  %p1405_p9 = scmp.lt.u32.totalorder %s1658_s9, %s1853_s0 }
  0x39   : > { %p1402_p5 = pnand %p1401_p3, %p1400_p0  ;;  %p1406_p1 = scmp.lt.u32.totalorder %s1404_s29, %s1399_s30 }
  0x3a   : > { %p1408_p4 = scmp.lt.u32.totalorder %s1399_s30, %s1658_s9 }
  0x3b   : > { %p1403_p7 = pneg %p1402_p5  ;;  %p1407_p2 = por %p1406_p1, %p1405_p9 }
  0x3d   : > { %p1409_p6 = por %p1408_p4, %p1407_p2 }
  0x3f   : > { %p1410_p8 = pnand %p1409_p6, %p1403_p7 }
  0x41   : > { %1413 = shalt.err (!%p1410_p8)
}
  0x42   : > { %s1414_s26 = scalar_lea.vmem %s1660_s18, 2048  ;;  %s1520_s21 = smov [#allocation2]  }
  0x43   : > { %p1415_p12 = scmp.ne.s32.totalorder %s1660_s18, %s1414_s26  ;;  %s1419_s4 = sshll.u32 %s1520_s21, 4  ;;  %s1420_s4 = int_to_ptr.vmem [resolvable:$false] %s1419_s4 }
  0x44   : > { %s1421_s6 = scalar_lea.vmem %s1420_s4, 4096  ;;  %p1422_p5 = scmp.lt.s32.totalorder %s1660_s18, %s1420_s4 }
  0x45   : > { %p1417_p11 = pnand %p1415_p12, %p1401_p3  ;;  %p1423_p9 = scmp.lt.s32.totalorder %s1421_s6, %s1414_s26 }
  0x47   : > { %p1418_p0 = pneg %p1417_p11  ;;  %p1424_p1 = por %p1423_p9, %p1422_p5 }
  0x49   : > { %p1425_p2 = pnand %p1424_p1, %p1418_p0 }
  0x4b   : > { %1428 = shalt.err (!%p1425_p2)
}
  0x4c   : > { %1285 = dma.hbm_to_vmem [thread:$0]  (!%p1664_p13), %s1658_s9, 2048, %s1660_s18, %s1668_s25, %s1518_s10, %s1518_s10, %s1519_s11  }
  0x4d   : > { %p1871_p3 = scmp.ne.s32.totalorder %s1865_s24, 0 }
  0x4e   : > { %s1702_s30 = sand.u32 (!%p1871_p3), 1, %s1499_s13   ;;  %p1872_p7 = scmp.ne.s32.totalorder (!%p1871_p3), %s1863_s22, 0 }
  0x4f   : > { %207 = sbr.rel (%p1871_p3) target bundleno = 392 (0x188), region = 32  ;;  %s988_s29 = sshll.u32 (!%p1871_p3), %s1702_s30, 7 }
  0x50   : > { %s210_s7 = scalar_lea.sflag (!%p1871_p3), [#allocation3], %s1702_s30  ;;  %s1708_s19 = scalar_lea.vmem (!%p1871_p3), [#allocation2], %s988_s29 }
  0x56   : > { %1482 = dma.done.wait (%p1872_p7), %s210_s7, 2048  }
  0x57   : > { %1484 = vsyncadd (%p1872_p7), %s210_s7, 4294965248  ;;  %p1873_p13 = scmp.ne.s32.totalorder %s1861_s20, 0 }
  0x59   : > { %1486 = dma.done.wait (%p1873_p13), [#allocation6], 1024  }
  0x5a   : > { %1488 = vsyncadd (%p1873_p13), [#allocation6], 4294966272  ;;  %v1347_v0 = vld [vmem:[#allocation5] sm:$0xff]   ;;  %v1348_v1 = vld [vmem:[#allocation5 + $0x8] sm:$0xff]   ;;  %s1753_s24 = scalar_lea.vmem [#allocation7], %s988_s29  ;;  %s1086_s10 = sshll.u32 %s1507_s15, 11 }
  0x5b   : > { %1206 = vmatprep.subr.bf16.mxu0 %v1347_v0  ;;  %1254 = vmatprep.subr.bf16.mxu1 %v1347_v0  ;;  %v1349_v2 = vld [vmem:[#allocation5 + $0x10] sm:$0xff]   ;;  %v1350_v3 = vld [vmem:[#allocation5 + $0x18] sm:$0xff]   ;;  %v1355_v4 = vld [vmem:[%s1708_s19] sm:$0xff]   ;;  %s876_s11 = sshll.u32 %s1753_s24, 4  ;;  %s1801_s25 = scalar_lea.hbm %s1856_s3, %s1086_s10  ;;  %s1803_s11 = int_to_ptr.vmem [resolvable:$true] %s876_s11 }
  0x5c   : > { %1207 = vmatpush3.bf16.msra.mxu0 %v1347_v0  ;;  %1262 = vmatpush3.bf16.msra.mxu1 %v1347_v0  ;;  %v1356_v5 = vld [vmem:[%s1708_s19 + $0x40] sm:$0xff]   ;;  %v1352_v7 = vld [vmem:[#allocation5 + $0x28] sm:$0xff]   ;;  %v1353_v8 = vld [vmem:[#allocation5 + $0x30] sm:$0xff]   ;;  %s861_s15 = scalar_lea.sflag [#allocation4], %s1702_s30  ;;  %s1429_s8 = scalar_lea.vmem %s1803_s11, 2048 }
  0x5d   : > { %1208 = vmatprep.subr.bf16.mxu0 %v1348_v1  ;;  %1255 = vmatprep.subr.bf16.mxu1 %v1348_v1  ;;  %v1351_v6 = vld [vmem:[#allocation5 + $0x20] sm:$0xff]   ;;  %v1354_v9 = vld [vmem:[#allocation5 + $0x38] sm:$0xff]   ;;  %v1357_v10 = vld [vmem:[%s1708_s19 + $0x8] sm:$0xff]   ;;  %p1430_p4 = scmp.ne.s32.totalorder %s1803_s11, %s1429_s8  ;;  %s1521_s26 = smov [#allocation7]  }
  0x5e   : > { %1222 = vmatprep.mubr.bf16.mxu0 %v1355_v4  ;;  %1238 = vmatprep.mubr.bf16.mxu1 %v1356_v5  ;;  %v1358_v11 = vld [vmem:[%s1708_s19 + $0x48] sm:$0xff]   ;;  %v1359_v12 = vld [vmem:[%s1708_s19 + $0x10] sm:$0xff]   ;;  %v1361_v14 = vld [vmem:[%s1708_s19 + $0x18] sm:$0xff]   ;;  %s1433_s21 = sshll.u32 %s1521_s26, 4  ;;  %s1434_s21 = int_to_ptr.vmem [resolvable:$false] %s1433_s21 }
  0x5f   : > { %v1360_v13 = vld [vmem:[%s1708_s19 + $0x50] sm:$0xff]   ;;  %v1362_v15 = vld [vmem:[%s1708_s19 + $0x58] sm:$0xff]   ;;  %v1363_v16 = vld [vmem:[%s1708_s19 + $0x20] sm:$0xff]   ;;  %p1431_p6 = pnand %p1430_p4, %p1643_p10  ;;  %s1435_s4 = scalar_lea.vmem %s1434_s21, 4096 }
  0x60   : > { %1209 = vmatpush3.bf16.msra.mxu0 %v1348_v1  ;;  %1263 = vmatpush3.bf16.msra.mxu1 %v1348_v1  ;;  %v1364_v17 = vld [vmem:[%s1708_s19 + $0x60] sm:$0xff]   ;;  %v1365_v18 = vld [vmem:[%s1708_s19 + $0x28] sm:$0xff]   ;;  %v1367_v20 = vld [vmem:[%s1708_s19 + $0x30] sm:$0xff]   ;;  %p1436_p12 = scmp.lt.s32.totalorder %s1803_s11, %s1434_s21  ;;  %p1437_p11 = scmp.lt.s32.totalorder %s1435_s4, %s1429_s8 }
  0x61   : > { %1210 = vmatprep.subr.bf16.mxu0 %v1349_v2  ;;  %1256 = vmatprep.subr.bf16.mxu1 %v1349_v2  ;;  %v1366_v19 = vld [vmem:[%s1708_s19 + $0x68] sm:$0xff]   ;;  %v1368_v21 = vld [vmem:[%s1708_s19 + $0x70] sm:$0xff]   ;;  %v1369_v22 = vld [vmem:[%s1708_s19 + $0x38] sm:$0xff]   ;;  %p1432_p8 = pneg %p1431_p6 }
  0x62   : > { %v1370_v23 = vld [vmem:[%s1708_s19 + $0x78] sm:$0xff]   ;;  %v1737_v24 = vld [vmem:[%s1855_s2] ss:$0 sm:$0xff]  ;;  %p1438_p0 = por %p1437_p11, %p1436_p12 }
  0x64   : > { %1211 = vmatpush3.bf16.msra.mxu0 %v1349_v2  ;;  %1264 = vmatpush3.bf16.msra.mxu1 %v1349_v2  ;;  %p1439_p5 = pnand %p1438_p0, %p1432_p8 }
  0x65   : > { %1212 = vmatprep.subr.bf16.mxu0 %v1350_v3  ;;  %1257 = vmatprep.subr.bf16.mxu1 %v1350_v3 }
  0x68   : > { %1213 = vmatpush3.bf16.msra.mxu0 %v1350_v3  ;;  %1265 = vmatpush3.bf16.msra.mxu1 %v1350_v3 }
  0x69   : > { %1214 = vmatprep.subr.bf16.mxu0 %v1351_v6  ;;  %1258 = vmatprep.subr.bf16.mxu1 %v1351_v6 }
  0x6c   : > { %1215 = vmatpush3.bf16.msra.mxu0 %v1351_v6  ;;  %1266 = vmatpush3.bf16.msra.mxu1 %v1351_v6 }
  0x6d   : > { %1216 = vmatprep.subr.bf16.mxu0 %v1352_v7  ;;  %1259 = vmatprep.subr.bf16.mxu1 %v1352_v7 }
  0x70   : > { %1217 = vmatpush3.bf16.msra.mxu0 %v1352_v7  ;;  %1267 = vmatpush3.bf16.msra.mxu1 %v1352_v7 }
  0x71   : > { %1218 = vmatprep.subr.bf16.mxu0 %v1353_v8  ;;  %1260 = vmatprep.subr.bf16.mxu1 %v1353_v8 }
  0x74   : > { %1219 = vmatpush3.bf16.msra.mxu0 %v1353_v8  ;;  %1268 = vmatpush3.bf16.msra.mxu1 %v1353_v8 }
  0x75   : > { %1220 = vmatprep.subr.bf16.mxu0 %v1354_v9  ;;  %1261 = vmatprep.subr.bf16.mxu1 %v1354_v9 }
  0x78   : > { %1221 = vmatpush3.bf16.msra.mxu0 %v1354_v9  ;;  %1269 = vmatpush3.bf16.msra.mxu1 %v1354_v9 }
  0x7b   : > { %1223 = vmatmul.mubr.bf16.vlgmr.msra.gmra.mrb[0].mxu0 %v1357_v10  ;;  %1239 = vmatmul.mubr.bf16.vlgmr.msra.gmra.mrb[0].mxu1 %v1358_v11 }
  0x7c   : > { %1226 = vmatprep.mubr.bf16.mxu0 %v1359_v12  ;;  %1242 = vmatprep.mubr.bf16.mxu1 %v1360_v13 }
  0x83   : > { %1227 = vmatmul.mubr.bf16.gmra.mrb[4].mxu0 %v1361_v14  ;;  %1243 = vmatmul.mubr.bf16.gmra.mrb[4].mxu1 %v1362_v15 }
  0x84   : > { %1230 = vmatprep.mubr.bf16.mxu0 %v1363_v16  ;;  %1246 = vmatprep.mubr.bf16.mxu1 %v1364_v17 }
  0x8b   : > { %1231 = vmatmul.mubr.bf16.gmra.mrb[8].mxu0 %v1365_v18  ;;  %1247 = vmatmul.mubr.bf16.gmra.mrb[8].mxu1 %v1366_v19 }
  0x8c   : > { %1234 = vmatprep.mubr.bf16.mxu0 %v1367_v20  ;;  %1250 = vmatprep.mubr.bf16.mxu1 %v1368_v21 }
  0x93   : > { %1235 = vmatmul.mubr.bf16.gmra.mrb[12].mxu0 %v1369_v22  ;;  %1251 = vmatmul.mubr.bf16.gmra.mrb[12].mxu1 %v1370_v23 }
 0x14e   : > { %v1224_v25 = vpop.f32.mrb[0].mxu0  ;;  %v1240_v26 = vpop.f32.mrb[0].mxu1 }
 0x14f   : > { %v486_v27 = vadd.f32 %v1224_v25, %v1737_v24  ;;  %v550_v28 = vadd.f32 %v1240_v26, %v1737_v24  ;;  %v477_v29 = vpop.f32.mrb[1].mxu0  ;;  %v541_v30 = vpop.f32.mrb[1].mxu1 }
 0x150   : > { %v478_v31 = vadd.f32 %v1737_v24, %v477_v29  ;;  %v542_v32 = vadd.f32 %v1737_v24, %v541_v30  ;;  %v1225_v33 = vpop.f32.mrb[2].mxu0  ;;  %v1241_v34 = vpop.f32.mrb[2].mxu1 }
 0x151   : > { %vm606_vm0 = vcmp.gt.f32.partialorder %v486_v27, 0.0  ;;  %v638_v35 = vmul.f32 0.2, %v486_v27  ;;  %vm622_vm1 = vcmp.gt.f32.partialorder %v550_v28, 0.0  ;;  %v654_v36 = vmul.f32 0.2, %v550_v28 }
 0x152   : > { %vm604_vm2 = vcmp.gt.f32.partialorder %v478_v31, 0.0  ;;  %v636_v37 = vmul.f32 0.2, %v478_v31  ;;  %vm620_vm3 = vcmp.gt.f32.partialorder %v542_v32, 0.0  ;;  %v652_v38 = vmul.f32 0.2, %v542_v32 }
 0x153   : > { %v489_v39 = vadd.f32 %v1225_v33, %v1737_v24  ;;  %v553_v40 = vadd.f32 %v1241_v34, %v1737_v24  ;;  %v480_v41 = vpop.f32.mrb[3].mxu0  ;;  %v544_v42 = vpop.f32.mrb[3].mxu1  ;;  %v670_v43 = vsel %vm606_vm0, %v486_v27, %v638_v35  ;;  %v686_v44 = vsel %vm622_vm1, %v550_v28, %v654_v36 }
 0x154   : > { %v481_v45 = vadd.f32 %v1737_v24, %v480_v41  ;;  %v545_v46 = vadd.f32 %v1737_v24, %v544_v42  ;;  %v668_v51 = vsel %vm604_vm2, %v478_v31, %v636_v37  ;;  %v684_v52 = vsel %vm620_vm3, %v542_v32, %v652_v38 }
 0x155   : > { %vm607_vm4 = vcmp.gt.f32.partialorder %v489_v39, 0.0  ;;  %v639_v47 = vmul.f32 0.2, %v489_v39  ;;  %vm623_vm5 = vcmp.gt.f32.partialorder %v553_v40, 0.0  ;;  %v655_v48 = vmul.f32 0.2, %v553_v40 }
 0x156   : > { %vm605_vm6 = vcmp.gt.f32.partialorder %v481_v45, 0.0  ;;  %v637_v49 = vmul.f32 0.2, %v481_v45  ;;  %vm621_vm7 = vcmp.gt.f32.partialorder %v545_v46, 0.0  ;;  %v653_v50 = vmul.f32 0.2, %v545_v46 }
 0x157   : > { %v671_v53 = vsel %vm607_vm4, %v489_v39, %v639_v47  ;;  %v687_v54 = vsel %vm623_vm5, %v553_v40, %v655_v48  ;;  %v1228_v55 = vpop.f32.mrb[4].mxu0  ;;  %v1244_v56 = vpop.f32.mrb[4].mxu1 }
 0x158   : > { %v1095_v57 = vpack.c.bf16 %v671_v53, %v670_v43  ;;  %v1135_v58 = vpack.c.bf16 %v687_v54, %v686_v44  ;;  %v669_v59 = vsel %vm605_vm6, %v481_v45, %v637_v49  ;;  %v685_v60 = vsel %vm621_vm7, %v545_v46, %v653_v50  ;;  %v493_v61 = vpop.f32.mrb[5].mxu0  ;;  %v557_v62 = vpop.f32.mrb[5].mxu1 }
 0x159   : > { %v1090_v63 = vpack.c.bf16 %v669_v59, %v668_v51  ;;  %v1130_v0 = vpack.c.bf16 %v685_v60, %v684_v52  ;;  %v502_v1 = vadd.f32 %v1228_v55, %v1737_v24  ;;  %v566_v2 = vadd.f32 %v1244_v56, %v1737_v24  ;;  %v1229_v3 = vpop.f32.mrb[6].mxu0  ;;  %v1245_v4 = vpop.f32.mrb[6].mxu1 }
 0x15a   : > { %1167 = vst [vmem:[%s1753_s24 + $0x8] sm:$0xff] %v1095_v57   ;;  %1175 = vst [vmem:[%s1753_s24 + $0x48] sm:$0xff] %v1135_v58   ;;  %v494_v5 = vadd.f32 %v1737_v24, %v493_v61  ;;  %v558_v6 = vadd.f32 %v1737_v24, %v557_v62  ;;  %v505_v7 = vadd.f32 %v1229_v3, %v1737_v24  ;;  %v496_v9 = vpop.f32.mrb[7].mxu0  ;;  %v560_v10 = vpop.f32.mrb[7].mxu1 }
 0x15b   : > { %v569_v8 = vadd.f32 %v1245_v4, %v1737_v24  ;;  %1091 = vst [vmem:[%s1753_s24] sm:$0xff] %v1090_v63   ;;  %1174 = vst [vmem:[%s1753_s24 + $0x40] sm:$0xff] %v1130_v0   ;;  %vm610_vm8 = vcmp.gt.f32.partialorder %v502_v1, 0.0  ;;  %v642_v11 = vmul.f32 0.2, %v502_v1  ;;  %vm626_vm9 = vcmp.gt.f32.partialorder %v566_v2, 0.0 }
 0x15c   : > { %v658_v12 = vmul.f32 0.2, %v566_v2  ;;  %vm608_vm10 = vcmp.gt.f32.partialorder %v494_v5, 0.0  ;;  %v640_v13 = vmul.f32 0.2, %v494_v5  ;;  %vm624_vm11 = vcmp.gt.f32.partialorder %v558_v6, 0.0 }
 0x15d   : > { %v674_v14 = vsel %vm610_vm8, %v502_v1, %v642_v11  ;;  %v656_v15 = vmul.f32 0.2, %v558_v6  ;;  %vm611_vm12 = vcmp.gt.f32.partialorder %v505_v7, 0.0  ;;  %v643_v16 = vmul.f32 0.2, %v505_v7 }
 0x15e   : > { %v690_v17 = vsel %vm626_vm9, %v566_v2, %v658_v12  ;;  %v672_v18 = vsel %vm608_vm10, %v494_v5, %v640_v13  ;;  %vm627_vm13 = vcmp.gt.f32.partialorder %v569_v8, 0.0  ;;  %v659_v19 = vmul.f32 0.2, %v569_v8  ;;  %v1232_v20 = vpop.f32.mrb[8].mxu0  ;;  %v1248_v21 = vpop.f32.mrb[8].mxu1 }
 0x15f   : > { %v675_v22 = vsel %vm611_vm12, %v505_v7, %v643_v16  ;;  %v497_v23 = vadd.f32 %v1737_v24, %v496_v9  ;;  %v561_v25 = vadd.f32 %v1737_v24, %v560_v10  ;;  %v518_v26 = vadd.f32 %v1232_v20, %v1737_v24  ;;  %v509_v27 = vpop.f32.mrb[9].mxu0  ;;  %v573_v28 = vpop.f32.mrb[9].mxu1 }
 0x160   : > { %v1105_v29 = vpack.c.bf16 %v675_v22, %v674_v14  ;;  %v691_v30 = vsel %vm627_vm13, %v569_v8, %v659_v19  ;;  %v582_v31 = vadd.f32 %v1248_v21, %v1737_v24  ;;  %v510_v32 = vadd.f32 %v1737_v24, %v509_v27  ;;  %v1233_v33 = vpop.f32.mrb[10].mxu0  ;;  %v1249_v34 = vpop.f32.mrb[10].mxu1 }
 0x161   : > { %v1145_v35 = vpack.c.bf16 %v691_v30, %v690_v17  ;;  %vm609_vm14 = vcmp.gt.f32.partialorder %v497_v23, 0.0  ;;  %v641_v36 = vmul.f32 0.2, %v497_v23  ;;  %vm625_vm15 = vcmp.gt.f32.partialorder %v561_v25, 0.0  ;;  %v512_v37 = vpop.f32.mrb[11].mxu0  ;;  %v576_v38 = vpop.f32.mrb[11].mxu1 }
 0x162   : > { %1169 = vst [vmem:[%s1753_s24 + $0x18] sm:$0xff] %v1105_v29   ;;  %v657_v39 = vmul.f32 0.2, %v561_v25  ;;  %vm614_vm0 = vcmp.gt.f32.partialorder %v518_v26, 0.0  ;;  %v646_v40 = vmul.f32 0.2, %v518_v26  ;;  %v688_v41 = vsel %vm624_vm11, %v558_v6, %v656_v15 }
 0x163   : > { %vm630_vm1 = vcmp.gt.f32.partialorder %v582_v31, 0.0  ;;  %1177 = vst [vmem:[%s1753_s24 + $0x58] sm:$0xff] %v1145_v35   ;;  %v673_v42 = vsel %vm609_vm14, %v497_v23, %v641_v36  ;;  %v662_v43 = vmul.f32 0.2, %v582_v31  ;;  %vm612_vm2 = vcmp.gt.f32.partialorder %v510_v32, 0.0 }
 0x164   : > { %v1100_v44 = vpack.c.bf16 %v673_v42, %v672_v18  ;;  %v689_v45 = vsel %vm625_vm15, %v561_v25, %v657_v39  ;;  %v644_v46 = vmul.f32 0.2, %v510_v32  ;;  %v574_v47 = vadd.f32 %v1737_v24, %v573_v28 }
 0x165   : > { %v1140_v48 = vpack.c.bf16 %v689_v45, %v688_v41  ;;  %v678_v49 = vsel %vm614_vm0, %v518_v26, %v646_v40  ;;  %v694_v50 = vsel %vm630_vm1, %v582_v31, %v662_v43  ;;  %v521_v51 = vadd.f32 %v1233_v33, %v1737_v24 }
 0x166   : > { %1168 = vst [vmem:[%s1753_s24 + $0x10] sm:$0xff] %v1100_v44   ;;  %vm628_vm3 = vcmp.gt.f32.partialorder %v574_v47, 0.0  ;;  %v660_v52 = vmul.f32 0.2, %v574_v47  ;;  %v585_v53 = vadd.f32 %v1249_v34, %v1737_v24  ;;  %v513_v54 = vadd.f32 %v1737_v24, %v512_v37  ;;  %v1236_v55 = vpop.f32.mrb[12].mxu0  ;;  %v1252_v56 = vpop.f32.mrb[12].mxu1 }
 0x167   : > { %1176 = vst [vmem:[%s1753_s24 + $0x50] sm:$0xff] %v1140_v48   ;;  %vm615_vm4 = vcmp.gt.f32.partialorder %v521_v51, 0.0  ;;  %v647_v57 = vmul.f32 0.2, %v521_v51  ;;  %v577_v58 = vadd.f32 %v1737_v24, %v576_v38  ;;  %v534_v59 = vadd.f32 %v1236_v55, %v1737_v24  ;;  %v525_v60 = vpop.f32.mrb[13].mxu0  ;;  %v589_v61 = vpop.f32.mrb[13].mxu1 }
 0x168   : > { %v676_v62 = vsel %vm612_vm2, %v510_v32, %v644_v46  ;;  %vm631_vm5 = vcmp.gt.f32.partialorder %v585_v53, 0.0  ;;  %v663_v63 = vmul.f32 0.2, %v585_v53  ;;  %vm613_vm6 = vcmp.gt.f32.partialorder %v513_v54, 0.0  ;;  %v1237_v0 = vpop.f32.mrb[14].mxu0  ;;  %v1253_v1 = vpop.f32.mrb[14].mxu1 }
 0x169   : > { %v679_v2 = vsel %vm615_vm4, %v521_v51, %v647_v57  ;;  %v645_v3 = vmul.f32 0.2, %v513_v54  ;;  %vm629_vm7 = vcmp.gt.f32.partialorder %v577_v58, 0.0  ;;  %v661_v4 = vmul.f32 0.2, %v577_v58  ;;  %v528_v5 = vpop.f32.mrb[15].mxu0 }
 0x16a   : > { %v692_v6 = vsel %vm628_vm3, %v574_v47, %v660_v52  ;;  %v1115_v7 = vpack.c.bf16 %v679_v2, %v678_v49  ;;  %v695_v8 = vsel %vm631_vm5, %v585_v53, %v663_v63  ;;  %v650_v9 = vmul.f32 0.2, %v534_v59  ;;  %v592_v10 = vpop.f32.mrb[15].mxu1 }
 0x16b   : > { %v1155_v11 = vpack.c.bf16 %v695_v8, %v694_v50  ;;  %v677_v12 = vsel %vm613_vm6, %v513_v54, %v645_v3  ;;  %v693_v13 = vsel %vm629_vm7, %v577_v58, %v661_v4  ;;  %v598_v14 = vadd.f32 %v1252_v56, %v1737_v24 }
 0x16c   : > { %1171 = vst [vmem:[%s1753_s24 + $0x28] sm:$0xff] %v1115_v7   ;;  %v1110_v15 = vpack.c.bf16 %v677_v12, %v676_v62  ;;  %v1150_v16 = vpack.c.bf16 %v693_v13, %v692_v6  ;;  %vm618_vm8 = vcmp.gt.f32.partialorder %v534_v59, 0.0  ;;  %v526_v17 = vadd.f32 %v1737_v24, %v525_v60 }
 0x16d   : > { %1179 = vst [vmem:[%s1753_s24 + $0x68] sm:$0xff] %v1155_v11   ;;  %vm634_vm9 = vcmp.gt.f32.partialorder %v598_v14, 0.0  ;;  %v666_v18 = vmul.f32 0.2, %v598_v14  ;;  %v590_v19 = vadd.f32 %v1737_v24, %v589_v61  ;;  %v537_v20 = vadd.f32 %v1237_v0, %v1737_v24 }
 0x16e   : > { %1170 = vst [vmem:[%s1753_s24 + $0x20] sm:$0xff] %v1110_v15   ;;  %1178 = vst [vmem:[%s1753_s24 + $0x60] sm:$0xff] %v1150_v16   ;;  %v648_v21 = vmul.f32 0.2, %v526_v17  ;;  %v601_v22 = vadd.f32 %v1253_v1, %v1737_v24  ;;  %v529_v23 = vadd.f32 %v1737_v24, %v528_v5  ;;  %v682_v25 = vsel %vm618_vm8, %v534_v59, %v650_v9 }
 0x16f   : > { %vm616_vm10 = vcmp.gt.f32.partialorder %v526_v17, 0.0  ;;  %vm619_vm11 = vcmp.gt.f32.partialorder %v537_v20, 0.0  ;;  %v698_v26 = vsel %vm634_vm9, %v598_v14, %v666_v18  ;;  %v651_v27 = vmul.f32 0.2, %v537_v20 }
 0x170   : > { %vm635_vm12 = vcmp.gt.f32.partialorder %v601_v22, 0.0  ;;  %v667_v28 = vmul.f32 0.2, %v601_v22  ;;  %vm632_vm13 = vcmp.gt.f32.partialorder %v590_v19, 0.0  ;;  %vm617_vm14 = vcmp.gt.f32.partialorder %v529_v23, 0.0 }
 0x171   : > { %v649_v29 = vmul.f32 0.2, %v529_v23  ;;  %v593_v30 = vadd.f32 %v1737_v24, %v592_v10  ;;  %v680_v31 = vsel %vm616_vm10, %v526_v17, %v648_v21  ;;  %v664_v32 = vmul.f32 0.2, %v590_v19 }
 0x172   : > { %v683_v33 = vsel %vm619_vm11, %v537_v20, %v651_v27  ;;  %v699_v34 = vsel %vm635_vm12, %v601_v22, %v667_v28 }
 0x173   : > { %v1125_v35 = vpack.c.bf16 %v683_v33, %v682_v25  ;;  %v1165_v36 = vpack.c.bf16 %v699_v34, %v698_v26  ;;  %v681_v37 = vsel %vm617_vm14, %v529_v23, %v649_v29  ;;  %vm633_vm15 = vcmp.gt.f32.partialorder %v593_v30, 0.0 }
 0x174   : > { %v1120_v38 = vpack.c.bf16 %v681_v37, %v680_v31  ;;  %v665_v39 = vmul.f32 0.2, %v593_v30  ;;  %v696_v24 = vsel %vm632_vm13, %v590_v19, %v664_v32 }
 0x175   : > { %1173 = vst [vmem:[%s1753_s24 + $0x38] sm:$0xff] %v1125_v35   ;;  %1181 = vst [vmem:[%s1753_s24 + $0x78] sm:$0xff] %v1165_v36  }
 0x176   : > { %1172 = vst [vmem:[%s1753_s24 + $0x30] sm:$0xff] %v1120_v38   ;;  %v697_v40 = vsel %vm633_vm15, %v593_v30, %v665_v39 }
 0x177   : > { %v1160_v41 = vpack.c.bf16 %v697_v40, %v696_v24 }
 0x179   : > { %1180 = vst [vmem:[%s1753_s24 + $0x70] sm:$0xff] %v1160_v41  }
 0x17a   : > { %1442 = shalt.err (!%p1439_p5)
}
 0x17b   : > { %s1443_s6 = scalar_lea.hbm %s1801_s25, 2048  ;;  %s1447_s19 = scalar_lea.hbm %s1856_s3, 4096 }
 0x17c   : > { %p1444_p9 = scmp.ne.s32.totalorder %s1801_s25, %s1443_s6  ;;  %p1448_p3 = scmp.lt.u32.totalorder %s1801_s25, %s1856_s3 }
 0x17d   : > { %p1449_p7 = scmp.lt.u32.totalorder %s1447_s19, %s1443_s6  ;;  %p1451_p4 = scmp.lt.u32.totalorder %s1443_s6, %s1801_s25 }
 0x17e   : > { %p1445_p1 = pnand %p1444_p9, %p1643_p10 }
 0x17f   : > { %p1450_p13 = por %p1449_p7, %p1448_p3 }
 0x180   : > { %p1446_p2 = pneg %p1445_p1 }
 0x181   : > { %p1452_p6 = por %p1451_p4, %p1450_p13 }
 0x183   : > { %p1453_p8 = pnand %p1452_p6, %p1446_p2 }
 0x185   : > { %1456 = shalt.err (!%p1453_p8)
}
 0x186   : > { %s1522_s24 = smov 64   ;;  %s1523_s10 = smov 4  }
 0x187   : > { %1276 = dma.vmem_to_hbm [thread:$0]  (%p1643_p10), %s1803_s11, 2048, %s1801_s25, %s861_s15, %s1522_s24, %s1522_s24, %s1523_s10  }
 0x188 PF: > { %s891_s9 = sand.u32 1, %s1495_s12   ;;  %p1874_p12 = scmp.ne.s32.totalorder %s1864_s23, 0 }
 0x189   : > { %p1875_p11 = scmp.ge.s32.totalorder %s1515_s17, 2  ;;  %s892_s18 = scalar_lea.sflag [#allocation4], %s891_s9 }
 0x18b   : > { %p1287_p0 = pnand %p1875_p11, %p1874_p12 }
 0x18d   : > { %1490 = dma.done.wait (!%p1287_p0), %s892_s18, 2048  }
 0x18e   : > { %1492 = vsyncadd (!%p1287_p0), %s892_s18, 4294965248  ;;  %s20_s17 = sadd.s32 1, %s1515_s17   ;;  %s1876_s12 = smov %s1499_s13 }
 0x18f   : > { %p17_p5 = scmp.ge.s32.totalorder %s20_s17, 4   ;;  %s1877_s13 = smov %s1503_s14 }
 0x190   : > { %s1878_s14 = smov %s1652_s5  ;;  %s1879_s15 = smov %s1511_s16 }
 0x191   : > { %s1880_s16 = smov %s1882_s28  ;;  %19 = sbr.rel (!%p17_p5) target bundleno = 7 (0x7), region = 82 }
 0x198   :  { %897 = vsyncpa [#allocation3], 1 }
 0x199   :  { %899 = vsyncpa [#allocation3 + $0x1], 1 }
 0x19a   :  { %900 = vsyncpa [#allocation6], 1 }
 0x19b   :  { %901 = vsyncpa [#allocation4], 1 }
 0x19c   :  { %903 = vsyncpa [#allocation4 + $0x1], 1 }

</bundles_post_ra>
